<compile_context>
chip_gen: v7x
topology: tpu7x:2x2x1
jax: 0.10.0
libtpu: 0.0.40
codegen_flags: <defaults>
</compile_context>

<pallas_src>
import jax
import jax.numpy as jnp
from jax.experimental import pallas as pl
from jax.experimental.pallas import tpu as pltpu


def _round_up(n, m):
    return ((n + m - 1) // m) * m


def _decoder_kernel(x_ref, w1_ref, b1_ref, w2_ref, b2_ref, w3_ref, b3_ref, o_ref):
    cdt = w1_ref.dtype  # matmul-operand dtype (f32 or bf16); accumulation is f32
    # Layer 1: Linear(z -> h) + ReLU
    h = jnp.dot(x_ref[...].astype(cdt), w1_ref[...],
                preferred_element_type=jnp.float32)
    h = jnp.maximum(h + b1_ref[...], 0.0)
    # Layer 2: Linear(h -> h) + ReLU
    h = jnp.dot(h.astype(cdt), w2_ref[...], preferred_element_type=jnp.float32)
    h = jnp.maximum(h + b2_ref[...], 0.0)
    # Layer 3: Linear(h -> x)  (no activation)
    y = jnp.dot(h.astype(cdt), w3_ref[...], preferred_element_type=jnp.float32)
    o_ref[...] = (y + b3_ref[...]).astype(o_ref.dtype)


def pad_decoder_params(params, *, compute_dtype=jnp.float32):
    """One-time (hoisted) padding of PyTorch-convention weights.

    Only the *output* feature dims (h, x) are padded to multiples of 128 for
    lane-dense MXU columns / unmasked output stores.  Padding with zeros is
    semantics-preserving (padded bias = 0, padded weight rows/cols = 0,
    ReLU(0) = 0).  Biases stay f32; weights are stored in `compute_dtype`.
    """
    h_dim, z_dim = params["w1"].shape
    x_dim = params["w3"].shape[0]
    hp = _round_up(h_dim, 128)
    xp = _round_up(x_dim, 128)

    def pad_w(w_t, shape):  # w_t: [in, out]
        out = jnp.zeros(shape, compute_dtype)
        return out.at[: w_t.shape[0], : w_t.shape[1]].set(w_t.astype(compute_dtype))

    def pad_b(b, n):
        return jnp.zeros((1, n), jnp.float32).at[0, : b.shape[0]].set(
            b.astype(jnp.float32))

    return {
        "w1t": pad_w(params["w1"].T, (z_dim, hp)),  # [z,  hp]  (K unpadded)
        "w2t": pad_w(params["w2"].T, (hp, hp)),     # [hp, hp]
        "w3t": pad_w(params["w3"].T, (hp, xp)),     # [hp, xp]
        "b1": pad_b(params["b1"], hp),
        "b2": pad_b(params["b2"], hp),
        "b3": pad_b(params["b3"], xp),
        "dims": (int(x_dim), int(h_dim), int(z_dim)),
    }


def decoder_forward(x, padded, *, tile_b=None):
    """x: [B, z_dim] float32.  padded: output of pad_decoder_params().

    Returns [B, x_dim] matching Decoder.forward(x).
    """
    B, z_dim = x.shape
    x_dim, h_dim, z_dim_p = padded["dims"]
    assert z_dim == z_dim_p, "x feature dim must match the decoder's z_dim"
    w1t, w2t, w3t = padded["w1t"], padded["w2t"], padded["w3t"]
    b1, b2, b3 = padded["b1"], padded["b2"], padded["b3"]
    hp = w1t.shape[1]
    xp = w3t.shape[1]
    dtype = x.dtype
    w_itemsize = jnp.dtype(w1t.dtype).itemsize

    # ---- batch tile selection (multiple of 8, VMEM-budgeted) ---------------
    if tile_b is None:
        if B <= 8:
            tile_b = _round_up(B, 8)
        else:
            # >= 2 grid steps so both v7x TensorCores get work; cap at 1024.
            tile_b = min(_round_up(-(-B // 2), 8), 1024)
            if tile_b >= 256:           # feed 256-wide MXU passes fully
                tile_b = (tile_b // 256) * 256
    tile_b = max(8, _round_up(int(tile_b), 8))

    # Resident (single-buffered) weights counted once; batch-tiled in/out
    # activation blocks double-buffered; f32 intermediates.
    weight_bytes = (z_dim * hp + hp * hp + hp * xp) * w_itemsize + (2 * hp + xp) * 4

    def act_bytes(tb):
        return (2 * tb * z_dim + 2 * tb * xp + 2 * tb * hp) * 4

    vmem_budget = 24 * 1024 * 1024  # fits v7x's 32 MiB scoped / 64 MiB physical
    while tile_b > 8 and weight_bytes + act_bytes(tile_b) > vmem_budget:
        tile_b = max(8, ((tile_b // 2) // 8) * 8)

    grid = (pl.cdiv(B, tile_b),)
    est_vmem = weight_bytes + act_bytes(tile_b)
    vmem_limit = int(min(max(2 * est_vmem, 16 * 1024 * 1024), 32 * 1024 * 1024))

    # ---- cost hint for the XLA scheduler ------------------------------------
    cost = pl.CostEstimate(
        flops=2 * B * (z_dim * hp + hp * hp + hp * xp),
        transcendentals=0,
        bytes_accessed=(B * z_dim * 4 + B * xp * 4
                        + (z_dim * hp + hp * hp + hp * xp) * w_itemsize
                        + (2 * hp + xp) * 4),
    )

    def build(single_buffer_weights):
        def wspec(shape):
            if single_buffer_weights:
                return pl.BlockSpec(shape, lambda i: (0, 0),
                                    pipeline_mode=pl.Buffered(1))
            return pl.BlockSpec(shape, lambda i: (0, 0))

        return pl.pallas_call(
            _decoder_kernel,
            out_shape=jax.ShapeDtypeStruct((B, xp), dtype),
            grid=grid,
            in_specs=[
                # batch tile of activations; last dim == full array dim (legal
                # even when z_dim < 128); final partial batch block is masked.
                pl.BlockSpec((tile_b, z_dim), lambda i: (i, 0)),
                wspec((z_dim, hp)),
                wspec((1, hp)),
                wspec((hp, hp)),
                wspec((1, hp)),
                wspec((hp, xp)),
                wspec((1, xp)),
            ],
            out_specs=pl.BlockSpec((tile_b, xp), lambda i: (i, 0)),
            compiler_params=pltpu.CompilerParams(
                dimension_semantics=("parallel",),
                vmem_limit_bytes=vmem_limit,
            ),
            cost_estimate=cost,
        )

    try:
        out_p = build(True)(x, w1t, b1, w2t, b2, w3t, b3)
    except Exception:
        # Fallback: default double-buffered weight specs (no pipeline_mode).
        out_p = build(False)(x, w1t, b1, w2t, b2, w3t, b3)

    # Only the feature padding (if any) needs slicing; batch is already exact.
    if xp != x_dim:
        out_p = out_p[:, :x_dim]
    return out_p


def init_decoder_params(key, x_dim, h_dim, z_dim):
    """Deterministic init mimicking nn.Linear's U(-1/sqrt(fan_in), ...).
    Weights kept in PyTorch convention: W[out, in]."""
    ks = jax.random.split(key, 6)

    def uniform(k, shape, fan_in):
        bound = 1.0 / jnp.sqrt(fan_in)
        return jax.random.uniform(k, shape, jnp.float32, -bound, bound)

    return {
        "w1": uniform(ks[0], (h_dim, z_dim), z_dim),
        "b1": uniform(ks[1], (h_dim,), z_dim),
        "w2": uniform(ks[2], (h_dim, h_dim), h_dim),
        "b2": uniform(ks[3], (h_dim,), h_dim),
        "w3": uniform(ks[4], (x_dim, h_dim), h_dim),
        "b3": uniform(ks[5], (x_dim,), h_dim),
    }


def decoder_reference(x, params):
    """Pure-JAX reference matching the PyTorch forward exactly."""
    h = jnp.maximum(x @ params["w1"].T + params["b1"], 0.0)
    h = jnp.maximum(h @ params["w2"].T + params["b2"], 0.0)
    return h @ params["w3"].T + params["b3"]


if __name__ == "__main__":
    # Small shapes consistent with the module.  B=30 (not a multiple of 8)
    # exercises the masked partial batch block; the auto tile gives a 2-step
    # "parallel" grid (v7x megacore), tile_b=8 gives a 4-step pipelined grid.
    B, z_dim, h_dim, x_dim = 30, 16, 32, 64

    key = jax.random.PRNGKey(0)
    k_params, k_x = jax.random.split(key)

    params = init_decoder_params(k_params, x_dim, h_dim, z_dim)
    x = jax.random.normal(k_x, (B, z_dim), jnp.float32)
    ref = decoder_reference(x, params)

    # Pad weights ONCE (hoisted out of the per-call path).
    padded_f32 = pad_decoder_params(params)

    out = jax.block_until_ready(decoder_forward(x, padded_f32, tile_b=8))
    assert out.shape == (B, x_dim)
    assert jnp.allclose(out, ref, atol=1e-5, rtol=1e-5), (
        f"max abs err = {jnp.max(jnp.abs(out - ref))}"
    )

    # Auto-chosen tile path (>= 2 grid steps).
    out2 = jax.block_until_ready(decoder_forward(x, padded_f32))
    assert jnp.allclose(out2, ref, atol=1e-5, rtol=1e-5)

    # bf16 matmul operands (v6e/v7x MXU + halved weight bytes); f32
    # accumulation / bias / ReLU, so only operand-rounding error remains.
    padded_bf16 = pad_decoder_params(params, compute_dtype=jnp.bfloat16)
    out3 = jax.block_until_ready(decoder_forward(x, padded_bf16))
    assert jnp.allclose(out3, ref, atol=3e-2, rtol=3e-2), (
        f"bf16 max abs err = {jnp.max(jnp.abs(out3 - ref))}"
    )

    print("KERNEL_OK")
</pallas_src>

<mosaic_0001>
module attributes {stable_mosaic.version = 11 : i64} {
  func.func @_decoder_kernel(%arg0: i32, %arg1: memref<8x16xf32, #tpu.memory_space<vmem>>, %arg2: memref<16x128xf32, #tpu.memory_space<vmem>>, %arg3: memref<1x128xf32, #tpu.memory_space<vmem>>, %arg4: memref<128x128xf32, #tpu.memory_space<vmem>>, %arg5: memref<1x128xf32, #tpu.memory_space<vmem>>, %arg6: memref<128x128xf32, #tpu.memory_space<vmem>>, %arg7: memref<1x128xf32, #tpu.memory_space<vmem>>, %arg8: memref<8x128xf32, #tpu.memory_space<vmem>>) attributes {dimension_semantics = [#tpu.dimension_semantics<parallel>], iteration_bounds = array<i64: 4>, scalar_prefetch = 0 : i64, scratch_operands = 0 : i64, tpu.core_type = #tpu.core_type<tc>, window_params = [{transform_indices = @transform_0, window_bounds = array<i64: 8, 16>}, {pipeline_mode = #tpu.pipeline_mode<synchronous>, transform_indices = @transform_1, window_bounds = array<i64: 16, 128>}, {pipeline_mode = #tpu.pipeline_mode<synchronous>, transform_indices = @transform_2, window_bounds = array<i64: 1, 128>}, {pipeline_mode = #tpu.pipeline_mode<synchronous>, transform_indices = @transform_3, window_bounds = array<i64: 128, 128>}, {pipeline_mode = #tpu.pipeline_mode<synchronous>, transform_indices = @transform_4, window_bounds = array<i64: 1, 128>}, {pipeline_mode = #tpu.pipeline_mode<synchronous>, transform_indices = @transform_5, window_bounds = array<i64: 128, 128>}, {pipeline_mode = #tpu.pipeline_mode<synchronous>, transform_indices = @transform_6, window_bounds = array<i64: 1, 128>}, {transform_indices = @transform_7, window_bounds = array<i64: 8, 128>}]} {
    %c0 = arith.constant 0 : index
    %c0_0 = arith.constant 0 : index
    %0 = vector.load %arg1[%c0, %c0_0] : memref<8x16xf32, #tpu.memory_space<vmem>>, vector<8x16xf32>
    %c0_1 = arith.constant 0 : index
    %c0_2 = arith.constant 0 : index
    %1 = vector.load %arg2[%c0_1, %c0_2] : memref<16x128xf32, #tpu.memory_space<vmem>>, vector<16x128xf32>
    %cst = arith.constant dense<0.000000e+00> : vector<8x128xf32>
    %2 = tpu.matmul %0, %1, %cst {dimension_numbers = #tpu.dot_dimension_numbers<[1], [0], [0], [1], [0, 0, 1, 1], [], []>} : vector<8x16xf32>, vector<16x128xf32>, vector<8x128xf32> -> vector<8x128xf32>
    %c0_3 = arith.constant 0 : index
    %c0_4 = arith.constant 0 : index
    %3 = vector.load %arg3[%c0_3, %c0_4] : memref<1x128xf32, #tpu.memory_space<vmem>>, vector<1x128xf32>
    %4 = vector.broadcast %3 : vector<1x128xf32> to vector<8x128xf32>
    %5 = arith.addf %2, %4 : vector<8x128xf32>
    %cst_5 = arith.constant 0.000000e+00 : f32
    %6 = vector.broadcast %cst_5 : f32 to vector<8x128xf32>
    %7 = arith.maximumf %5, %6 : vector<8x128xf32>
    %c0_6 = arith.constant 0 : index
    %c0_7 = arith.constant 0 : index
    %8 = vector.load %arg4[%c0_6, %c0_7] : memref<128x128xf32, #tpu.memory_space<vmem>>, vector<128x128xf32>
    %cst_8 = arith.constant dense<0.000000e+00> : vector<8x128xf32>
    %9 = tpu.matmul %7, %8, %cst_8 {dimension_numbers = #tpu.dot_dimension_numbers<[1], [0], [0], [1], [0, 0, 1, 1], [], []>} : vector<8x128xf32>, vector<128x128xf32>, vector<8x128xf32> -> vector<8x128xf32>
    %c0_9 = arith.constant 0 : index
    %c0_10 = arith.constant 0 : index
    %10 = vector.load %arg5[%c0_9, %c0_10] : memref<1x128xf32, #tpu.memory_space<vmem>>, vector<1x128xf32>
    %11 = vector.broadcast %10 : vector<1x128xf32> to vector<8x128xf32>
    %12 = arith.addf %9, %11 : vector<8x128xf32>
    %cst_11 = arith.constant 0.000000e+00 : f32
    %13 = vector.broadcast %cst_11 : f32 to vector<8x128xf32>
    %14 = arith.maximumf %12, %13 : vector<8x128xf32>
    %c0_12 = arith.constant 0 : index
    %c0_13 = arith.constant 0 : index
    %15 = vector.load %arg6[%c0_12, %c0_13] : memref<128x128xf32, #tpu.memory_space<vmem>>, vector<128x128xf32>
    %cst_14 = arith.constant dense<0.000000e+00> : vector<8x128xf32>
    %16 = tpu.matmul %14, %15, %cst_14 {dimension_numbers = #tpu.dot_dimension_numbers<[1], [0], [0], [1], [0, 0, 1, 1], [], []>} : vector<8x128xf32>, vector<128x128xf32>, vector<8x128xf32> -> vector<8x128xf32>
    %c0_15 = arith.constant 0 : index
    %c0_16 = arith.constant 0 : index
    %17 = vector.load %arg7[%c0_15, %c0_16] : memref<1x128xf32, #tpu.memory_space<vmem>>, vector<1x128xf32>
    %18 = vector.broadcast %17 : vector<1x128xf32> to vector<8x128xf32>
    %19 = arith.addf %16, %18 : vector<8x128xf32>
    %c0_17 = arith.constant 0 : index
    %c0_18 = arith.constant 0 : index
    %20 = vector.load %arg8[%c0_17, %c0_18] : memref<8x128xf32, #tpu.memory_space<vmem>>, vector<8x128xf32>
    tpu.vector_store %arg8[%c0_17, %c0_18], %19 {strides = array<i32>} : memref<8x128xf32, #tpu.memory_space<vmem>>, vector<8x128xf32>,
    return
  }
  func.func @transform_0(%arg0: i32) -> (i32, i32) {
    %c0_i32 = arith.constant 0 : i32
    %c0_i32_0 = arith.constant 0 : i32
    return %arg0, %c0_i32 : i32, i32
  }
  func.func @transform_1(%arg0: i32) -> (i32, i32) {
    %c0_i32 = arith.constant 0 : i32
    %c0_i32_0 = arith.constant 0 : i32
    %c0_i32_1 = arith.constant 0 : i32
    return %c0_i32, %c0_i32_0 : i32, i32
  }
  func.func @transform_2(%arg0: i32) -> (i32, i32) {
    %c0_i32 = arith.constant 0 : i32
    %c0_i32_0 = arith.constant 0 : i32
    %c0_i32_1 = arith.constant 0 : i32
    return %c0_i32, %c0_i32_0 : i32, i32
  }
  func.func @transform_3(%arg0: i32) -> (i32, i32) {
    %c0_i32 = arith.constant 0 : i32
    %c0_i32_0 = arith.constant 0 : i32
    %c0_i32_1 = arith.constant 0 : i32
    return %c0_i32, %c0_i32_0 : i32, i32
  }
  func.func @transform_4(%arg0: i32) -> (i32, i32) {
    %c0_i32 = arith.constant 0 : i32
    %c0_i32_0 = arith.constant 0 : i32
    %c0_i32_1 = arith.constant 0 : i32
    return %c0_i32, %c0_i32_0 : i32, i32
  }
  func.func @transform_5(%arg0: i32) -> (i32, i32) {
    %c0_i32 = arith.constant 0 : i32
    %c0_i32_0 = arith.constant 0 : i32
    %c0_i32_1 = arith.constant 0 : i32
    return %c0_i32, %c0_i32_0 : i32, i32
  }
  func.func @transform_6(%arg0: i32) -> (i32, i32) {
    %c0_i32 = arith.constant 0 : i32
    %c0_i32_0 = arith.constant 0 : i32
    %c0_i32_1 = arith.constant 0 : i32
    return %c0_i32, %c0_i32_0 : i32, i32
  }
  func.func @transform_7(%arg0: i32) -> (i32, i32) {
    %c0_i32 = arith.constant 0 : i32
    %c0_i32_0 = arith.constant 0 : i32
    return %arg0, %c0_i32 : i32, i32
  }
}

module attributes {stable_mosaic.version = 11 : i64} {
  func.func @_decoder_kernel(%arg0: i32, %arg1: memref<8x16xf32, #tpu.memory_space<vmem>>, %arg2: memref<16x128xf32, #tpu.memory_space<vmem>>, %arg3: memref<1x128xf32, #tpu.memory_space<vmem>>, %arg4: memref<128x128xf32, #tpu.memory_space<vmem>>, %arg5: memref<1x128xf32, #tpu.memory_space<vmem>>, %arg6: memref<128x128xf32, #tpu.memory_space<vmem>>, %arg7: memref<1x128xf32, #tpu.memory_space<vmem>>, %arg8: memref<8x128xf32, #tpu.memory_space<vmem>>) attributes {dimension_semantics = [#tpu.dimension_semantics<parallel>], iteration_bounds = array<i64: 4>, scalar_prefetch = 0 : i64, scratch_operands = 0 : i64, tpu.core_type = #tpu.core_type<tc>, window_params = [{transform_indices = @transform_0, window_bounds = array<i64: 8, 16>}, {pipeline_mode = #tpu.pipeline_mode<synchronous>, transform_indices = @transform_1, window_bounds = array<i64: 16, 128>}, {pipeline_mode = #tpu.pipeline_mode<synchronous>, transform_indices = @transform_2, window_bounds = array<i64: 1, 128>}, {pipeline_mode = #tpu.pipeline_mode<synchronous>, transform_indices = @transform_3, window_bounds = array<i64: 128, 128>}, {pipeline_mode = #tpu.pipeline_mode<synchronous>, transform_indices = @transform_4, window_bounds = array<i64: 1, 128>}, {pipeline_mode = #tpu.pipeline_mode<synchronous>, transform_indices = @transform_5, window_bounds = array<i64: 128, 128>}, {pipeline_mode = #tpu.pipeline_mode<synchronous>, transform_indices = @transform_6, window_bounds = array<i64: 1, 128>}, {transform_indices = @transform_7, window_bounds = array<i64: 8, 128>}]} {
    %c0 = arith.constant 0 : index
    %c0_0 = arith.constant 0 : index
    %0 = vector.load %arg1[%c0, %c0_0] : memref<8x16xf32, #tpu.memory_space<vmem>>, vector<8x16xf32>
    %c0_1 = arith.constant 0 : index
    %c0_2 = arith.constant 0 : index
    %1 = vector.load %arg2[%c0_1, %c0_2] : memref<16x128xf32, #tpu.memory_space<vmem>>, vector<16x128xf32>
    %cst = arith.constant dense<0.000000e+00> : vector<8x128xf32>
    %2 = tpu.matmul %0, %1, %cst {dimension_numbers = #tpu.dot_dimension_numbers<[1], [0], [0], [1], [0, 0, 1, 1], [], []>} : vector<8x16xf32>, vector<16x128xf32>, vector<8x128xf32> -> vector<8x128xf32>
    %c0_3 = arith.constant 0 : index
    %c0_4 = arith.constant 0 : index
    %3 = vector.load %arg3[%c0_3, %c0_4] : memref<1x128xf32, #tpu.memory_space<vmem>>, vector<1x128xf32>
    %4 = vector.broadcast %3 : vector<1x128xf32> to vector<8x128xf32>
    %5 = arith.addf %2, %4 : vector<8x128xf32>
    %cst_5 = arith.constant 0.000000e+00 : f32
    %6 = vector.broadcast %cst_5 : f32 to vector<8x128xf32>
    %7 = arith.maximumf %5, %6 : vector<8x128xf32>
    %c0_6 = arith.constant 0 : index
    %c0_7 = arith.constant 0 : index
    %8 = vector.load %arg4[%c0_6, %c0_7] : memref<128x128xf32, #tpu.memory_space<vmem>>, vector<128x128xf32>
    %cst_8 = arith.constant dense<0.000000e+00> : vector<8x128xf32>
    %9 = tpu.matmul %7, %8, %cst_8 {dimension_numbers = #tpu.dot_dimension_numbers<[1], [0], [0], [1], [0, 0, 1, 1], [], []>} : vector<8x128xf32>, vector<128x128xf32>, vector<8x128xf32> -> vector<8x128xf32>
    %c0_9 = arith.constant 0 : index
    %c0_10 = arith.constant 0 : index
    %10 = vector.load %arg5[%c0_9, %c0_10] : memref<1x128xf32, #tpu.memory_space<vmem>>, vector<1x128xf32>
    %11 = vector.broadcast %10 : vector<1x128xf32> to vector<8x128xf32>
    %12 = arith.addf %9, %11 : vector<8x128xf32>
    %cst_11 = arith.constant 0.000000e+00 : f32
    %13 = vector.broadcast %cst_11 : f32 to vector<8x128xf32>
    %14 = arith.maximumf %12, %13 : vector<8x128xf32>
    %c0_12 = arith.constant 0 : index
    %c0_13 = arith.constant 0 : index
    %15 = vector.load %arg6[%c0_12, %c0_13] : memref<128x128xf32, #tpu.memory_space<vmem>>, vector<128x128xf32>
    %cst_14 = arith.constant dense<0.000000e+00> : vector<8x128xf32>
    %16 = tpu.matmul %14, %15, %cst_14 {dimension_numbers = #tpu.dot_dimension_numbers<[1], [0], [0], [1], [0, 0, 1, 1], [], []>} : vector<8x128xf32>, vector<128x128xf32>, vector<8x128xf32> -> vector<8x128xf32>
    %c0_15 = arith.constant 0 : index
    %c0_16 = arith.constant 0 : index
    %17 = vector.load %arg7[%c0_15, %c0_16] : memref<1x128xf32, #tpu.memory_space<vmem>>, vector<1x128xf32>
    %18 = vector.broadcast %17 : vector<1x128xf32> to vector<8x128xf32>
    %19 = arith.addf %16, %18 : vector<8x128xf32>
    %c0_17 = arith.constant 0 : index
    %c0_18 = arith.constant 0 : index
    %20 = vector.load %arg8[%c0_17, %c0_18] : memref<8x128xf32, #tpu.memory_space<vmem>>, vector<8x128xf32>
    tpu.vector_store %arg8[%c0_17, %c0_18], %19 {strides = array<i32>} : memref<8x128xf32, #tpu.memory_space<vmem>>, vector<8x128xf32>,
    return
  }
  func.func @transform_0(%arg0: i32) -> (i32, i32) {
    %c0_i32 = arith.constant 0 : i32
    %c0_i32_0 = arith.constant 0 : i32
    return %arg0, %c0_i32 : i32, i32
  }
  func.func @transform_1(%arg0: i32) -> (i32, i32) {
    %c0_i32 = arith.constant 0 : i32
    %c0_i32_0 = arith.constant 0 : i32
    %c0_i32_1 = arith.constant 0 : i32
    return %c0_i32, %c0_i32_0 : i32, i32
  }
  func.func @transform_2(%arg0: i32) -> (i32, i32) {
    %c0_i32 = arith.constant 0 : i32
    %c0_i32_0 = arith.constant 0 : i32
    %c0_i32_1 = arith.constant 0 : i32
    return %c0_i32, %c0_i32_0 : i32, i32
  }
  func.func @transform_3(%arg0: i32) -> (i32, i32) {
    %c0_i32 = arith.constant 0 : i32
    %c0_i32_0 = arith.constant 0 : i32
    %c0_i32_1 = arith.constant 0 : i32
    return %c0_i32, %c0_i32_0 : i32, i32
  }
  func.func @transform_4(%arg0: i32) -> (i32, i32) {
    %c0_i32 = arith.constant 0 : i32
    %c0_i32_0 = arith.constant 0 : i32
    %c0_i32_1 = arith.constant 0 : i32
    return %c0_i32, %c0_i32_0 : i32, i32
  }
  func.func @transform_5(%arg0: i32) -> (i32, i32) {
    %c0_i32 = arith.constant 0 : i32
    %c0_i32_0 = arith.constant 0 : i32
    %c0_i32_1 = arith.constant 0 : i32
    return %c0_i32, %c0_i32_0 : i32, i32
  }
  func.func @transform_6(%arg0: i32) -> (i32, i32) {
    %c0_i32 = arith.constant 0 : i32
    %c0_i32_0 = arith.constant 0 : i32
    %c0_i32_1 = arith.constant 0 : i32
    return %c0_i32, %c0_i32_0 : i32, i32
  }
  func.func @transform_7(%arg0: i32) -> (i32, i32) {
    %c0_i32 = arith.constant 0 : i32
    %c0_i32_0 = arith.constant 0 : i32
    return %arg0, %c0_i32 : i32, i32
  }
}

</mosaic_0001>

<bundles_post_ra>
// kernel: tpu_custom_call.1
= control target key start
LH: loop header
LB: loop body
LE: loop exit
PB: predicated region body
PF: predicated region fallthrough
CT: control target
= control target key end

     0   :  { %12 = vsyncpa [#allocation3], 0  ;;  %s1303_s0 = inlined_call_operand.vmem [shape: f32[30,16], index: 0, kind: input, shape index: {}]   ;;  %s1304_s1 = inlined_call_operand.vmem [shape: f32[16,128], index: 1, kind: input, shape index: {}]   ;;  %s1305_s2 = inlined_call_operand.vmem [shape: f32[1,128], index: 2, kind: input, shape index: {}]   ;;  %s1306_s3 = inlined_call_operand.hbm [shape: f32[128,128], index: 3, kind: input, shape index: {}]   ;;  %s1307_s4 = inlined_call_operand.vmem [shape: f32[1,128], index: 4, kind: input, shape index: {}]   ;;  %s1308_s5 = inlined_call_operand.hbm [shape: f32[128,128], index: 5, kind: input, shape index: {}]   ;;  %s1309_s6 = inlined_call_operand.vmem [shape: f32[1,128], index: 6, kind: input, shape index: {}]   ;;  %s1310_s7 = inlined_call_operand.hbm [shape: f32[30,128], index: 7, kind: output, shape index: {}]  }
   0x1   :  { %13 = vsyncpa [#allocation6], 0 }
   0x2   :  { %14 = vsyncpa [#allocation4], 0 }
   0x3   :  { %16 = vsyncpa [#allocation4 + $0x1], 0  ;;  %s1096_s24 = smov 0   ;;  %s1098_s25 = smov 0  }
   0x4   :  { %s1100_s26 = smov 0   ;;  %s1102_s27 = smov 0  }
   0x5 LB: > { %s1117_s28 = sadd.s32 4294967295, %s1046_s27   ;;  %s672_s29 = sadd.s32 4294967294, %s1046_s27   ;;  %s1046_s27 = sphi %s1102_s27, %s1330_s27   ;;  %s1042_s26 = sphi %s1100_s26, %s1329_s26   ;;  %s1038_s25 = sphi %s1098_s25, %s1328_s25   ;;  %s1034_s24 = sphi %s1096_s24, %s1327_s24  }
   0x6   : > { %s1121_s30 = sadd.s32 1, %s1046_s27   ;;  %s181_s8 = sadd.s32 1, %s1042_s26 }
   0x7   : > { %s178_s9 = ssub.s32 %s1046_s27, %s1121_s30  ;;  %p191_p0 = scmp.ne.s32.totalorder %s1042_s26, %s1038_s25 }
   0x8   : > { %p179_p1 = scmp.eq.s32.totalorder %s178_s9, 0  ;;  %p192_p2 = scmp.eq.s32.totalorder %s1117_s28, 3 }
   0x9   : > { %p197_p3 = scmp.ne.s32.totalorder %s1038_s25, %s1034_s24  ;;  %p198_p4 = scmp.eq.s32.totalorder %s672_s29, 3 }
   0xa   : > { %s1132_s10 = scalar_select %p179_p1, %s1042_s26, %s181_s8  }
   0xb   : > { %p1134_p5 = por %p192_p2, %p191_p0  ;;  %p1138_p6 = por %p198_p4, %p197_p3 }
   0xc   : > { %1314 = sst [smem:[#allocation11_spill]] %s1132_s10  ;;  %p673_p7 = scmp.ge.s32.totalorder %s1046_s27, 1 }
   0xd   : > { %s1315_s11 = scalar_select %p1134_p5, 1, 0 }
   0xe   : > { %s1316_s12 = scalar_select %p1138_p6, 1, 0 }
   0xf   : > { %p205_p8 = scmp.lt.s32.totalorder %s1046_s27, 5  ;;  %p1311_p9 = scmp.eq.s32.totalorder %s1117_s28, 0 }
  0x10   : > { %s1048_s14 = smov [#allocation2]   ;;  %s1049_s17 = smov [#allocation5]  }
  0x11   : > { %p1145_p10 = pnand %p673_p7, %p205_p8  ;;  %s223_s15 = sshll.u32 %s1048_s14, 4  ;;  %s224_s15 = int_to_ptr.vmem [resolvable:$true] %s223_s15 }
  0x12   : > { %s239_s18 = sshll.u32 %s1049_s17, 4  ;;  %s920_s21 = scalar_lea.hbm %s1306_s3, 2048  ;;  %s1157_s18 = int_to_ptr.vmem [resolvable:$true] %s239_s18 }
  0x13   : > { %s1317_s13 = scalar_select %p1145_p10, 1, 0 }
  0x14   : > { %p865_p11 = pneg %p1145_p10  ;;  %p921_p13 = scmp.ne.s32.totalorder %s1306_s3, %s920_s21 }
  0x15   : > { %p927_p3 = scmp.lt.u32.totalorder %s920_s21, %s1306_s3 }
  0x16   : > { %p1153_p12 = pnand %p1311_p9, %p865_p11 }
  0x18   : > { %p922_p0 = pneg %p1153_p12 }
  0x1a   : > { %p923_p1 = pnand %p922_p0, %p921_p13 }
  0x1c   : > { %p924_p2 = pneg %p923_p1 }
  0x1e   : > { %p929_p4 = pnand %p927_p3, %p924_p2 }
  0x20   : > { %932 = shalt.err (!%p929_p4)
}
  0x21   : > { %s933_s9 = scalar_lea.vmem %s224_s15, 2048  ;;  %p941_p9 = scmp.lt.s32.totalorder %s224_s15, %s224_s15 }
  0x22   : > { %p934_p7 = scmp.ne.s32.totalorder %s224_s15, %s933_s9  ;;  %p942_p6 = scmp.lt.s32.totalorder %s933_s9, %s933_s9 }
  0x24   : > { %p936_p8 = pnand %p934_p7, %p922_p0  ;;  %p943_p5 = por %p942_p6, %p941_p9 }
  0x26   : > { %p937_p11 = pneg %p936_p8 }
  0x28   : > { %p944_p10 = pnand %p943_p5, %p937_p11 }
  0x2a   : > { %947 = shalt.err (!%p944_p10)
}
  0x2b   : > { %s1050_s14 = smov 128   ;;  %s1051_s17 = smov 8  }
  0x2c   : > { %868 = dma.hbm_to_vmem [thread:$0]  (!%p1153_p12), %s1306_s3, 2048, %s224_s15, [#allocation3], %s1050_s14, %s1050_s14, %s1051_s17  }
  0x2d   : > { %s948_s23 = scalar_lea.hbm %s1308_s5, 2048 }
  0x2e   : > { %p949_p13 = scmp.ne.s32.totalorder %s1308_s5, %s948_s23  ;;  %p955_p9 = scmp.lt.u32.totalorder %s948_s23, %s1308_s5 }
  0x30   : > { %p951_p5 = pnand %p949_p13, %p922_p0 }
  0x32   : > { %p952_p6 = pneg %p951_p5 }
  0x34   : > { %p957_p10 = pnand %p955_p9, %p952_p6 }
  0x36   : > { %960 = shalt.err (!%p957_p10)
}
  0x37   : > { %s961_s15 = scalar_lea.vmem %s1157_s18, 2048  ;;  %p969_p4 = scmp.lt.s32.totalorder %s1157_s18, %s1157_s18 }
  0x38   : > { %p962_p1 = scmp.ne.s32.totalorder %s1157_s18, %s961_s15  ;;  %p970_p7 = scmp.lt.s32.totalorder %s961_s15, %s961_s15 }
  0x3a   : > { %p964_p2 = pnand %p962_p1, %p922_p0  ;;  %p971_p8 = por %p970_p7, %p969_p4 }
  0x3c   : > { %p965_p3 = pneg %p964_p2 }
  0x3e   : > { %p972_p11 = pnand %p971_p8, %p965_p3 }
  0x40   : > { %975 = shalt.err (!%p972_p11)
}
  0x41   : > { %871 = dma.hbm_to_vmem [thread:$0]  (!%p1153_p12), %s1308_s5, 2048, %s1157_s18, [#allocation6], %s1050_s14, %s1050_s14, %s1051_s17  }
  0x42   : > { %p1319_p13 = scmp.ne.s32.totalorder %s1317_s13, 0 }
  0x43   : > { %p1320_p5 = scmp.eq.s32.totalorder (!%p1319_p13), %s1117_s28, 0 }
  0x44   : > { %265 = sbr.rel (%p1319_p13) target bundleno = 747 (0x2eb), region = 48 }
  0x4b   : > { %1021 = dma.done.wait (%p1320_p5), [#allocation3], 2048   ;;  %p1321_p0 = pmov %p1320_p5 }
  0x4d   : > { %1023 = vsyncadd (%p1321_p0), [#allocation3], 4294965248  ;;  %p1322_p6 = pmov %p1321_p0 }
  0x4e   : > { %p1323_p9 = pmov %p1321_p0 }
  0x4f   : > { %1025 = dma.done.wait (%p1322_p6), [#allocation6], 2048  }
  0x50   : > { %1027 = vsyncadd (%p1323_p9), [#allocation6], 4294965248  ;;  %p300_p10 = scmp.lt.s32.totalorder %s1117_s28, 3  ;;  %v1052_v0 = vmov 0.0|0.0   ;;  %vm1053_vm0 = vmmov 0   ;;  %v1054_v1 = vmov 0.0  }
  0x51   : > { %804 = vmatprep.subr.bf16.mxu0 %v1052_v0  ;;  %731 = vmatprep.mubr.msk.f32.mxu0 %vm1053_vm0, %v1054_v1  ;;  %v305_v2 = vld [vmem:[%s1304_s1] sm:$0xff]  ;;  %v306_v3 = vld [vmem:[%s1304_s1 + $0x8] sm:$0xff]  ;;  %v391_v7 = vld [vmem:[#allocation2 + $0x10] sm:$0xff]  ;;  %vm314_vm1 = vcmask 130048   ;;  %s297_s10 = sand.u32 1, %s1038_s25   ;;  %s687_s18 = sshll.u32 %s1117_s28, 7 }
  0x52   : > { %s301_s13 = scalar_select %p300_p10, %s1117_s28, 3  ;;  %807 = vmatprep.subr.bf16.mxu1 %v1052_v0  ;;  %766 = vmatprep.mubr.msk.f32.mxu1 %vm1053_vm0, %v1054_v1  ;;  %v805_v4 = vpack.c.bf16 %v306_v3, %v305_v2  ;;  %v389_v5 = vld [vmem:[#allocation2] sm:$0xff]  ;;  %v390_v6 = vld [vmem:[#allocation2 + $0x8] sm:$0xff]  ;;  %v392_v9 = vld [vmem:[#allocation2 + $0x18] sm:$0xff] }
  0x53   : > { %v808_v8 = vpack.c.bf16 %v390_v6, %v389_v5  ;;  %v811_v11 = vpack.c.bf16 %v392_v9, %v391_v7  ;;  %v393_v12 = vld [vmem:[#allocation2 + $0x20] sm:$0xff]  ;;  %v394_v13 = vld [vmem:[#allocation2 + $0x28] sm:$0xff]  ;;  %v395_v15 = vld [vmem:[#allocation2 + $0x30] sm:$0xff]  ;;  %s680_s19 = sshll.u32 %s297_s10, 3  ;;  %s1261_s22 = scalar_lea.hbm %s1310_s7, %s687_s18 }
  0x54   : > { %s681_s16 = sshll.u32 %s301_s13, 3  ;;  %806 = vmatpush3.bf16.msra.mxu0 %v805_v4  ;;  %v814_v14 = vpack.c.bf16 %v394_v13, %v393_v12  ;;  %v396_v16 = vld [vmem:[#allocation2 + $0x38] sm:$0xff]  ;;  %v397_v18 = vld [vmem:[#allocation2 + $0x40] sm:$0xff]  ;;  %v398_v19 = vld [vmem:[#allocation2 + $0x48] sm:$0xff]  ;;  %s299_s14 = scalar_lea.vmem [#allocation7], %s680_s19 }
  0x55   : > { %s303_s23 = scalar_lea.vmem %s1303_s0, %s681_s16  ;;  %809 = vmatpush3.bf16.msra.mxu1 %v808_v8  ;;  %831 = vmatprep.subr.bf16.mxu0 %v1052_v0  ;;  %v817_v17 = vpack.c.bf16 %v396_v16, %v395_v15  ;;  %v820_v20 = vpack.c.bf16 %v398_v19, %v397_v18  ;;  %v399_v21 = vld [vmem:[#allocation2 + $0x50] sm:$0xff]  ;;  %v400_v22 = vld [vmem:[#allocation2 + $0x58] sm:$0xff]  ;;  %v401_v24 = vld [vmem:[#allocation2 + $0x60] sm:$0xff]  ;;  %s591_s17 = sshll.u32 %s299_s14, 4  ;;  %s1263_s17 = int_to_ptr.vmem [resolvable:$true] %s591_s17 }
  0x56   : > { %v304_v10 = vld [vmem:[%s303_s23] sm:$0xff]  ;;  %810 = vmatprep.subr.bf16.mxu1 %v1052_v0  ;;  %v823_v23 = vpack.c.bf16 %v400_v22, %v399_v21  ;;  %v402_v25 = vld [vmem:[#allocation2 + $0x68] sm:$0xff]  ;;  %v403_v27 = vld [vmem:[#allocation2 + $0x70] sm:$0xff]  ;;  %s578_s23 = scalar_lea.sflag [#allocation4], %s297_s10  ;;  %s976_s29 = scalar_lea.vmem %s1263_s17, 128 }
  0x57   : > { %732 = vmatmul.mubr.msk.f32.vlgmr.msra.gmra.mrb[0].mxu0 %vm314_vm1, %v304_v10  ;;  %v826_v26 = vpack.c.bf16 %v402_v25, %v401_v24  ;;  %v404_v28 = vld [vmem:[#allocation2 + $0x78] sm:$0xff]  ;;  %v483_v30 = vld [vmem:[#allocation5] sm:$0xff]  ;;  %v484_v31 = vld [vmem:[#allocation5 + $0x8] sm:$0xff]  ;;  %p977_p12 = scmp.ne.s32.totalorder %s1263_s17, %s976_s29  ;;  %p1324_p1 = scmp.ne.s32.totalorder %s1315_s11, 0 }
  0x58   : > { %801 = vmatprep.mubr.msk.f32.mxu0 %vm1053_vm0, %v1054_v1  ;;  %v829_v29 = vpack.c.bf16 %v404_v28, %v403_v27  ;;  %v485_v32 = vld [vmem:[#allocation5 + $0x10] sm:$0xff]  ;;  %v832_v33 = vpack.c.bf16 %v484_v31, %v483_v30  ;;  %v486_v34 = vld [vmem:[#allocation5 + $0x18] sm:$0xff]  ;;  %v487_v36 = vld [vmem:[#allocation5 + $0x20] sm:$0xff]  ;;  %s1055_s28 = smov [#allocation7]  }
  0x59   : > { %812 = vmatpush3.bf16.msra.mxu1 %v811_v11  ;;  %v835_v35 = vpack.c.bf16 %v486_v34, %v485_v32  ;;  %v488_v37 = vld [vmem:[#allocation5 + $0x28] sm:$0xff]  ;;  %v489_v39 = vld [vmem:[#allocation5 + $0x30] sm:$0xff]  ;;  %v490_v40 = vld [vmem:[#allocation5 + $0x38] sm:$0xff]  ;;  %p978_p2 = pnand %p977_p12, %p1324_p1  ;;  %s980_s8 = sshll.u32 %s1055_s28, 4  ;;  %s981_s8 = int_to_ptr.vmem [resolvable:$false] %s980_s8 }
  0x5a   : > { %813 = vmatprep.subr.bf16.mxu1 %v1052_v0  ;;  %833 = vmatpush3.bf16.msra.mxu0 %v832_v33  ;;  %v838_v38 = vpack.c.bf16 %v488_v37, %v487_v36  ;;  %v841_v41 = vpack.c.bf16 %v490_v40, %v489_v39  ;;  %v491_v42 = vld [vmem:[#allocation5 + $0x40] sm:$0xff]  ;;  %v492_v43 = vld [vmem:[#allocation5 + $0x48] sm:$0xff]  ;;  %v493_v45 = vld [vmem:[#allocation5 + $0x50] sm:$0xff]  ;;  %s982_s9 = scalar_lea.vmem %s981_s8, 256  ;;  %p983_p4 = scmp.lt.s32.totalorder %s1263_s17, %s981_s8 }
  0x5b   : > { %834 = vmatprep.subr.bf16.mxu0 %v1052_v0  ;;  %v844_v44 = vpack.c.bf16 %v492_v43, %v491_v42  ;;  %v494_v46 = vld [vmem:[#allocation5 + $0x58] sm:$0xff]  ;;  %v495_v48 = vld [vmem:[#allocation5 + $0x60] sm:$0xff]  ;;  %v496_v49 = vld [vmem:[#allocation5 + $0x68] sm:$0xff]  ;;  %p979_p3 = pneg %p978_p2  ;;  %p984_p7 = scmp.lt.s32.totalorder %s982_s9, %s976_s29 }
  0x5c   : > { %v847_v47 = vpack.c.bf16 %v494_v46, %v493_v45  ;;  %v850_v50 = vpack.c.bf16 %v496_v49, %v495_v48  ;;  %v682_v51 = vld [vmem:[%s1305_s2] ss:$0 sm:$0xff]  ;;  %v497_v56 = vld [vmem:[#allocation5 + $0x70] sm:$0xff]  ;;  %v498_v57 = vld [vmem:[#allocation5 + $0x78] sm:$0xff] }
  0x5d   : > { %815 = vmatpush3.bf16.msra.mxu1 %v814_v14  ;;  %v853_v58 = vpack.c.bf16 %v498_v57, %v497_v56  ;;  %v684_v59 = vld [vmem:[%s1307_s4] ss:$0 sm:$0xff]  ;;  %p985_p8 = por %p984_p7, %p983_p4 }
  0x5e   : > { %816 = vmatprep.subr.bf16.mxu1 %v1052_v0  ;;  %836 = vmatpush3.bf16.msra.mxu0 %v835_v35 }
  0x5f   : > { %837 = vmatprep.subr.bf16.mxu0 %v1052_v0  ;;  %p986_p11 = pnand %p985_p8, %p979_p3 }
  0x61   : > { %818 = vmatpush3.bf16.msra.mxu1 %v817_v17 }
  0x62   : > { %819 = vmatprep.subr.bf16.mxu1 %v1052_v0  ;;  %839 = vmatpush3.bf16.msra.mxu0 %v838_v38 }
  0x63   : > { %840 = vmatprep.subr.bf16.mxu0 %v1052_v0 }
  0x65   : > { %821 = vmatpush3.bf16.msra.mxu1 %v820_v20 }
  0x66   : > { %822 = vmatprep.subr.bf16.mxu1 %v1052_v0  ;;  %842 = vmatpush3.bf16.msra.mxu0 %v841_v41 }
  0x67   : > { %843 = vmatprep.subr.bf16.mxu0 %v1052_v0 }
  0x69   : > { %824 = vmatpush3.bf16.msra.mxu1 %v823_v23 }
  0x6a   : > { %825 = vmatprep.subr.bf16.mxu1 %v1052_v0  ;;  %845 = vmatpush3.bf16.msra.mxu0 %v844_v44 }
  0x6b   : > { %846 = vmatprep.subr.bf16.mxu0 %v1052_v0 }
  0x6d   : > { %827 = vmatpush3.bf16.msra.mxu1 %v826_v26 }
  0x6e   : > { %828 = vmatprep.subr.bf16.mxu1 %v1052_v0  ;;  %848 = vmatpush3.bf16.msra.mxu0 %v847_v47 }
  0x6f   : > { %849 = vmatprep.subr.bf16.mxu0 %v1052_v0 }
  0x71   : > { %830 = vmatpush3.bf16.msra.mxu1 %v829_v29 }
  0x72   : > { %851 = vmatpush3.bf16.msra.mxu0 %v850_v50 }
  0x73   : > { %852 = vmatprep.subr.bf16.mxu0 %v1052_v0  ;;  %v685_v0 = vld [vmem:[%s1309_s6] ss:$0 sm:$0xff] }
  0x76   : > { %854 = vmatpush3.bf16.msra.mxu0 %v853_v58 }
 0x12a   : > { %v384_v52 = vpop.f32.mrb[0].mxu0 }
 0x12b   : > { %v385_v53 = vadd.f32 %v682_v51, %v384_v52  ;;  %v733_v54 = vpop.f32.mrb[1].mxu0 }
 0x12d   : > { %v388_v55 = vmax.f32 %v385_v53, 0.0 }
 0x12f   : > { %767 = vmatmul.mubr.f32.vlgmr.msra.gmra.mrb[0].mxu1 %v388_v55 }
 0x202   : > { %v478_v60 = vpop.f32.mrb[0].mxu1 }
 0x203   : > { %v479_v61 = vadd.f32 %v684_v59, %v478_v60  ;;  %v768_v62 = vpop.f32.mrb[1].mxu1 }
 0x205   : > { %v482_v63 = vmax.f32 %v479_v61, 0.0 }
 0x207   : > { %802 = vmatmul.mubr.f32.vlgmr.msra.gmra.mrb[2].mxu0 %v482_v63 }
 0x2da   : > { %v572_v1 = vpop.f32.mrb[2].mxu0 }
 0x2db   : > { %v573_v2 = vadd.f32 %v685_v0, %v572_v1  ;;  %v803_v3 = vpop.f32.mrb[3].mxu0 }
 0x2dd   : > { %576 = vst [vmem:[%s299_s14] sm:$0xff] %v573_v2 }
 0x2de   : > { %989 = shalt.err (!%p986_p11)
}
 0x2df   : > { %s990_s15 = scalar_lea.hbm %s1261_s22, 128  ;;  %s994_s13 = scalar_lea.hbm %s1310_s7, 512 }
 0x2e0   : > { %p991_p13 = scmp.ne.s32.totalorder %s1261_s22, %s990_s15  ;;  %p995_p6 = scmp.lt.u32.totalorder %s1261_s22, %s1310_s7 }
 0x2e1   : > { %p996_p9 = scmp.lt.u32.totalorder %s994_s13, %s990_s15  ;;  %p998_p12 = scmp.lt.u32.totalorder %s990_s15, %s1261_s22 }
 0x2e2   : > { %p992_p5 = pnand %p991_p13, %p1324_p1 }
 0x2e3   : > { %p997_p10 = por %p996_p9, %p995_p6 }
 0x2e4   : > { %p993_p0 = pneg %p992_p5 }
 0x2e5   : > { %p999_p2 = por %p998_p12, %p997_p10 }
 0x2e7   : > { %p1000_p3 = pnand %p999_p2, %p993_p0 }
 0x2e9   : > { %1003 = shalt.err (!%p1000_p3)
}
 0x2ea   : > { %863 = dma.vmem_to_hbm [thread:$0]  (%p1324_p1), %s1263_s17, 128, %s1261_s22, %s578_s23  }
 0x2eb PF: > { %p880_p4 = scmp.ge.s32.totalorder %s1046_s27, 2  ;;  %s603_s14 = sand.u32 1, %s1034_s24  }
 0x2ec   : > { %p1325_p7 = scmp.ne.s32.totalorder %s1316_s12, 0  ;;  %s604_s20 = scalar_lea.sflag [#allocation4], %s603_s14 }
 0x2ee   : > { %p873_p8 = pnand %p880_p4, %p1325_p7 }
 0x2f0   : > { %1029 = dma.done.wait (!%p873_p8), %s604_s20, 128  }
 0x2f1   : > { %1031 = vsyncadd (!%p873_p8), %s604_s20, 4294967168  ;;  %s1326_s21 = sld [smem:[#allocation11_spill]]  ;;  %p19_p11 = scmp.ge.s32.totalorder %s1121_s30, 6  }
 0x2f2   : > { %s1327_s24 = smov %s1038_s25  ;;  %s1328_s25 = smov %s1042_s26 }
 0x2f3   : > { %s1330_s27 = smov %s1121_s30  ;;  %21 = sbr.rel (!%p19_p11) target bundleno = 5 (0x5), region = 92 }
 0x2f7   : > { %s1329_s26 = smov %s1326_s21 }
 0x2fa   :  { %609 = vsyncpa [#allocation3], 1 }
 0x2fb   :  { %611 = vsyncpa [#allocation3 + $0x1], 1 }
 0x2fc   :  { %612 = vsyncpa [#allocation6], 1 }
 0x2fd   :  { %613 = vsyncpa [#allocation4], 1 }
 0x2fe   :  { %615 = vsyncpa [#allocation4 + $0x1], 1 }

// kernel: tpu_custom_call.1
= control target key start
LH: loop header
LB: loop body
LE: loop exit
PB: predicated region body
PF: predicated region fallthrough
CT: control target
= control target key end

     0   :  { %12 = vsyncpa [#allocation3], 0  ;;  %s1303_s0 = inlined_call_operand.vmem [shape: f32[30,16], index: 0, kind: input, shape index: {}]   ;;  %s1304_s1 = inlined_call_operand.vmem [shape: f32[16,128], index: 1, kind: input, shape index: {}]   ;;  %s1305_s2 = inlined_call_operand.vmem [shape: f32[1,128], index: 2, kind: input, shape index: {}]   ;;  %s1306_s3 = inlined_call_operand.hbm [shape: f32[128,128], index: 3, kind: input, shape index: {}]   ;;  %s1307_s4 = inlined_call_operand.vmem [shape: f32[1,128], index: 4, kind: input, shape index: {}]   ;;  %s1308_s5 = inlined_call_operand.hbm [shape: f32[128,128], index: 5, kind: input, shape index: {}]   ;;  %s1309_s6 = inlined_call_operand.vmem [shape: f32[1,128], index: 6, kind: input, shape index: {}]   ;;  %s1310_s7 = inlined_call_operand.hbm [shape: f32[30,128], index: 7, kind: output, shape index: {}]  }
   0x1   :  { %13 = vsyncpa [#allocation6], 0 }
   0x2   :  { %14 = vsyncpa [#allocation4], 0 }
   0x3   :  { %16 = vsyncpa [#allocation4 + $0x1], 0  ;;  %s1096_s24 = smov 0   ;;  %s1098_s25 = smov 0  }
   0x4   :  { %s1100_s26 = smov 0   ;;  %s1102_s27 = smov 0  }
   0x5 LB: > { %s1117_s28 = sadd.s32 4294967295, %s1046_s27   ;;  %s672_s29 = sadd.s32 4294967294, %s1046_s27   ;;  %s1046_s27 = sphi %s1102_s27, %s1330_s27   ;;  %s1042_s26 = sphi %s1100_s26, %s1329_s26   ;;  %s1038_s25 = sphi %s1098_s25, %s1328_s25   ;;  %s1034_s24 = sphi %s1096_s24, %s1327_s24  }
   0x6   : > { %s1121_s30 = sadd.s32 1, %s1046_s27   ;;  %s181_s8 = sadd.s32 1, %s1042_s26 }
   0x7   : > { %s178_s9 = ssub.s32 %s1046_s27, %s1121_s30  ;;  %p191_p0 = scmp.ne.s32.totalorder %s1042_s26, %s1038_s25 }
   0x8   : > { %p179_p1 = scmp.eq.s32.totalorder %s178_s9, 0  ;;  %p192_p2 = scmp.eq.s32.totalorder %s1117_s28, 3 }
   0x9   : > { %p197_p3 = scmp.ne.s32.totalorder %s1038_s25, %s1034_s24  ;;  %p198_p4 = scmp.eq.s32.totalorder %s672_s29, 3 }
   0xa   : > { %s1132_s10 = scalar_select %p179_p1, %s1042_s26, %s181_s8  }
   0xb   : > { %p1134_p5 = por %p192_p2, %p191_p0  ;;  %p1138_p6 = por %p198_p4, %p197_p3 }
   0xc   : > { %1314 = sst [smem:[#allocation11_spill]] %s1132_s10  ;;  %p673_p7 = scmp.ge.s32.totalorder %s1046_s27, 1 }
   0xd   : > { %s1315_s11 = scalar_select %p1134_p5, 1, 0 }
   0xe   : > { %s1316_s12 = scalar_select %p1138_p6, 1, 0 }
   0xf   : > { %p205_p8 = scmp.lt.s32.totalorder %s1046_s27, 5  ;;  %p1311_p9 = scmp.eq.s32.totalorder %s1117_s28, 0 }
  0x10   : > { %s1048_s14 = smov [#allocation2]   ;;  %s1049_s17 = smov [#allocation5]  }
  0x11   : > { %p1145_p10 = pnand %p673_p7, %p205_p8  ;;  %s223_s15 = sshll.u32 %s1048_s14, 4  ;;  %s224_s15 = int_to_ptr.vmem [resolvable:$true] %s223_s15 }
  0x12   : > { %s239_s18 = sshll.u32 %s1049_s17, 4  ;;  %s920_s21 = scalar_lea.hbm %s1306_s3, 2048  ;;  %s1157_s18 = int_to_ptr.vmem [resolvable:$true] %s239_s18 }
  0x13   : > { %s1317_s13 = scalar_select %p1145_p10, 1, 0 }
  0x14   : > { %p865_p11 = pneg %p1145_p10  ;;  %p921_p13 = scmp.ne.s32.totalorder %s1306_s3, %s920_s21 }
  0x15   : > { %p927_p3 = scmp.lt.u32.totalorder %s920_s21, %s1306_s3 }
  0x16   : > { %p1153_p12 = pnand %p1311_p9, %p865_p11 }
  0x18   : > { %p922_p0 = pneg %p1153_p12 }
  0x1a   : > { %p923_p1 = pnand %p922_p0, %p921_p13 }
  0x1c   : > { %p924_p2 = pneg %p923_p1 }
  0x1e   : > { %p929_p4 = pnand %p927_p3, %p924_p2 }
  0x20   : > { %932 = shalt.err (!%p929_p4)
}
  0x21   : > { %s933_s9 = scalar_lea.vmem %s224_s15, 2048  ;;  %p941_p9 = scmp.lt.s32.totalorder %s224_s15, %s224_s15 }
  0x22   : > { %p934_p7 = scmp.ne.s32.totalorder %s224_s15, %s933_s9  ;;  %p942_p6 = scmp.lt.s32.totalorder %s933_s9, %s933_s9 }
  0x24   : > { %p936_p8 = pnand %p934_p7, %p922_p0  ;;  %p943_p5 = por %p942_p6, %p941_p9 }
  0x26   : > { %p937_p11 = pneg %p936_p8 }
  0x28   : > { %p944_p10 = pnand %p943_p5, %p937_p11 }
  0x2a   : > { %947 = shalt.err (!%p944_p10)
}
  0x2b   : > { %s1050_s14 = smov 128   ;;  %s1051_s17 = smov 8  }
  0x2c   : > { %868 = dma.hbm_to_vmem [thread:$0]  (!%p1153_p12), %s1306_s3, 2048, %s224_s15, [#allocation3], %s1050_s14, %s1050_s14, %s1051_s17  }
  0x2d   : > { %s948_s23 = scalar_lea.hbm %s1308_s5, 2048 }
  0x2e   : > { %p949_p13 = scmp.ne.s32.totalorder %s1308_s5, %s948_s23  ;;  %p955_p9 = scmp.lt.u32.totalorder %s948_s23, %s1308_s5 }
  0x30   : > { %p951_p5 = pnand %p949_p13, %p922_p0 }
  0x32   : > { %p952_p6 = pneg %p951_p5 }
  0x34   : > { %p957_p10 = pnand %p955_p9, %p952_p6 }
  0x36   : > { %960 = shalt.err (!%p957_p10)
}
  0x37   : > { %s961_s15 = scalar_lea.vmem %s1157_s18, 2048  ;;  %p969_p4 = scmp.lt.s32.totalorder %s1157_s18, %s1157_s18 }
  0x38   : > { %p962_p1 = scmp.ne.s32.totalorder %s1157_s18, %s961_s15  ;;  %p970_p7 = scmp.lt.s32.totalorder %s961_s15, %s961_s15 }
  0x3a   : > { %p964_p2 = pnand %p962_p1, %p922_p0  ;;  %p971_p8 = por %p970_p7, %p969_p4 }
  0x3c   : > { %p965_p3 = pneg %p964_p2 }
  0x3e   : > { %p972_p11 = pnand %p971_p8, %p965_p3 }
  0x40   : > { %975 = shalt.err (!%p972_p11)
}
  0x41   : > { %871 = dma.hbm_to_vmem [thread:$0]  (!%p1153_p12), %s1308_s5, 2048, %s1157_s18, [#allocation6], %s1050_s14, %s1050_s14, %s1051_s17  }
  0x42   : > { %p1319_p13 = scmp.ne.s32.totalorder %s1317_s13, 0 }
  0x43   : > { %p1320_p5 = scmp.eq.s32.totalorder (!%p1319_p13), %s1117_s28, 0 }
  0x44   : > { %265 = sbr.rel (%p1319_p13) target bundleno = 747 (0x2eb), region = 48 }
  0x4b   : > { %1021 = dma.done.wait (%p1320_p5), [#allocation3], 2048   ;;  %p1321_p0 = pmov %p1320_p5 }
  0x4d   : > { %1023 = vsyncadd (%p1321_p0), [#allocation3], 4294965248  ;;  %p1322_p6 = pmov %p1321_p0 }
  0x4e   : > { %p1323_p9 = pmov %p1321_p0 }
  0x4f   : > { %1025 = dma.done.wait (%p1322_p6), [#allocation6], 2048  }
  0x50   : > { %1027 = vsyncadd (%p1323_p9), [#allocation6], 4294965248  ;;  %p300_p10 = scmp.lt.s32.totalorder %s1117_s28, 3  ;;  %v1052_v0 = vmov 0.0|0.0   ;;  %vm1053_vm0 = vmmov 0   ;;  %v1054_v1 = vmov 0.0  }
  0x51   : > { %804 = vmatprep.subr.bf16.mxu0 %v1052_v0  ;;  %731 = vmatprep.mubr.msk.f32.mxu0 %vm1053_vm0, %v1054_v1  ;;  %v305_v2 = vld [vmem:[%s1304_s1] sm:$0xff]  ;;  %v306_v3 = vld [vmem:[%s1304_s1 + $0x8] sm:$0xff]  ;;  %v391_v7 = vld [vmem:[#allocation2 + $0x10] sm:$0xff]  ;;  %vm314_vm1 = vcmask 130048   ;;  %s297_s10 = sand.u32 1, %s1038_s25   ;;  %s687_s18 = sshll.u32 %s1117_s28, 7 }
  0x52   : > { %s301_s13 = scalar_select %p300_p10, %s1117_s28, 3  ;;  %807 = vmatprep.subr.bf16.mxu1 %v1052_v0  ;;  %766 = vmatprep.mubr.msk.f32.mxu1 %vm1053_vm0, %v1054_v1  ;;  %v805_v4 = vpack.c.bf16 %v306_v3, %v305_v2  ;;  %v389_v5 = vld [vmem:[#allocation2] sm:$0xff]  ;;  %v390_v6 = vld [vmem:[#allocation2 + $0x8] sm:$0xff]  ;;  %v392_v9 = vld [vmem:[#allocation2 + $0x18] sm:$0xff] }
  0x53   : > { %v808_v8 = vpack.c.bf16 %v390_v6, %v389_v5  ;;  %v811_v11 = vpack.c.bf16 %v392_v9, %v391_v7  ;;  %v393_v12 = vld [vmem:[#allocation2 + $0x20] sm:$0xff]  ;;  %v394_v13 = vld [vmem:[#allocation2 + $0x28] sm:$0xff]  ;;  %v395_v15 = vld [vmem:[#allocation2 + $0x30] sm:$0xff]  ;;  %s680_s19 = sshll.u32 %s297_s10, 3  ;;  %s1261_s22 = scalar_lea.hbm %s1310_s7, %s687_s18 }
  0x54   : > { %s681_s16 = sshll.u32 %s301_s13, 3  ;;  %806 = vmatpush3.bf16.msra.mxu0 %v805_v4  ;;  %v814_v14 = vpack.c.bf16 %v394_v13, %v393_v12  ;;  %v396_v16 = vld [vmem:[#allocation2 + $0x38] sm:$0xff]  ;;  %v397_v18 = vld [vmem:[#allocation2 + $0x40] sm:$0xff]  ;;  %v398_v19 = vld [vmem:[#allocation2 + $0x48] sm:$0xff]  ;;  %s299_s14 = scalar_lea.vmem [#allocation7], %s680_s19 }
  0x55   : > { %s303_s23 = scalar_lea.vmem %s1303_s0, %s681_s16  ;;  %809 = vmatpush3.bf16.msra.mxu1 %v808_v8  ;;  %831 = vmatprep.subr.bf16.mxu0 %v1052_v0  ;;  %v817_v17 = vpack.c.bf16 %v396_v16, %v395_v15  ;;  %v820_v20 = vpack.c.bf16 %v398_v19, %v397_v18  ;;  %v399_v21 = vld [vmem:[#allocation2 + $0x50] sm:$0xff]  ;;  %v400_v22 = vld [vmem:[#allocation2 + $0x58] sm:$0xff]  ;;  %v401_v24 = vld [vmem:[#allocation2 + $0x60] sm:$0xff]  ;;  %s591_s17 = sshll.u32 %s299_s14, 4  ;;  %s1263_s17 = int_to_ptr.vmem [resolvable:$true] %s591_s17 }
  0x56   : > { %v304_v10 = vld [vmem:[%s303_s23] sm:$0xff]  ;;  %810 = vmatprep.subr.bf16.mxu1 %v1052_v0  ;;  %v823_v23 = vpack.c.bf16 %v400_v22, %v399_v21  ;;  %v402_v25 = vld [vmem:[#allocation2 + $0x68] sm:$0xff]  ;;  %v403_v27 = vld [vmem:[#allocation2 + $0x70] sm:$0xff]  ;;  %s578_s23 = scalar_lea.sflag [#allocation4], %s297_s10  ;;  %s976_s29 = scalar_lea.vmem %s1263_s17, 128 }
  0x57   : > { %732 = vmatmul.mubr.msk.f32.vlgmr.msra.gmra.mrb[0].mxu0 %vm314_vm1, %v304_v10  ;;  %v826_v26 = vpack.c.bf16 %v402_v25, %v401_v24  ;;  %v404_v28 = vld [vmem:[#allocation2 + $0x78] sm:$0xff]  ;;  %v483_v30 = vld [vmem:[#allocation5] sm:$0xff]  ;;  %v484_v31 = vld [vmem:[#allocation5 + $0x8] sm:$0xff]  ;;  %p977_p12 = scmp.ne.s32.totalorder %s1263_s17, %s976_s29  ;;  %p1324_p1 = scmp.ne.s32.totalorder %s1315_s11, 0 }
  0x58   : > { %801 = vmatprep.mubr.msk.f32.mxu0 %vm1053_vm0, %v1054_v1  ;;  %v829_v29 = vpack.c.bf16 %v404_v28, %v403_v27  ;;  %v485_v32 = vld [vmem:[#allocation5 + $0x10] sm:$0xff]  ;;  %v832_v33 = vpack.c.bf16 %v484_v31, %v483_v30  ;;  %v486_v34 = vld [vmem:[#allocation5 + $0x18] sm:$0xff]  ;;  %v487_v36 = vld [vmem:[#allocation5 + $0x20] sm:$0xff]  ;;  %s1055_s28 = smov [#allocation7]  }
  0x59   : > { %812 = vmatpush3.bf16.msra.mxu1 %v811_v11  ;;  %v835_v35 = vpack.c.bf16 %v486_v34, %v485_v32  ;;  %v488_v37 = vld [vmem:[#allocation5 + $0x28] sm:$0xff]  ;;  %v489_v39 = vld [vmem:[#allocation5 + $0x30] sm:$0xff]  ;;  %v490_v40 = vld [vmem:[#allocation5 + $0x38] sm:$0xff]  ;;  %p978_p2 = pnand %p977_p12, %p1324_p1  ;;  %s980_s8 = sshll.u32 %s1055_s28, 4  ;;  %s981_s8 = int_to_ptr.vmem [resolvable:$false] %s980_s8 }
  0x5a   : > { %813 = vmatprep.subr.bf16.mxu1 %v1052_v0  ;;  %833 = vmatpush3.bf16.msra.mxu0 %v832_v33  ;;  %v838_v38 = vpack.c.bf16 %v488_v37, %v487_v36  ;;  %v841_v41 = vpack.c.bf16 %v490_v40, %v489_v39  ;;  %v491_v42 = vld [vmem:[#allocation5 + $0x40] sm:$0xff]  ;;  %v492_v43 = vld [vmem:[#allocation5 + $0x48] sm:$0xff]  ;;  %v493_v45 = vld [vmem:[#allocation5 + $0x50] sm:$0xff]  ;;  %s982_s9 = scalar_lea.vmem %s981_s8, 256  ;;  %p983_p4 = scmp.lt.s32.totalorder %s1263_s17, %s981_s8 }
  0x5b   : > { %834 = vmatprep.subr.bf16.mxu0 %v1052_v0  ;;  %v844_v44 = vpack.c.bf16 %v492_v43, %v491_v42  ;;  %v494_v46 = vld [vmem:[#allocation5 + $0x58] sm:$0xff]  ;;  %v495_v48 = vld [vmem:[#allocation5 + $0x60] sm:$0xff]  ;;  %v496_v49 = vld [vmem:[#allocation5 + $0x68] sm:$0xff]  ;;  %p979_p3 = pneg %p978_p2  ;;  %p984_p7 = scmp.lt.s32.totalorder %s982_s9, %s976_s29 }
  0x5c   : > { %v847_v47 = vpack.c.bf16 %v494_v46, %v493_v45  ;;  %v850_v50 = vpack.c.bf16 %v496_v49, %v495_v48  ;;  %v682_v51 = vld [vmem:[%s1305_s2] ss:$0 sm:$0xff]  ;;  %v497_v56 = vld [vmem:[#allocation5 + $0x70] sm:$0xff]  ;;  %v498_v57 = vld [vmem:[#allocation5 + $0x78] sm:$0xff] }
  0x5d   : > { %815 = vmatpush3.bf16.msra.mxu1 %v814_v14  ;;  %v853_v58 = vpack.c.bf16 %v498_v57, %v497_v56  ;;  %v684_v59 = vld [vmem:[%s1307_s4] ss:$0 sm:$0xff]  ;;  %p985_p8 = por %p984_p7, %p983_p4 }
  0x5e   : > { %816 = vmatprep.subr.bf16.mxu1 %v1052_v0  ;;  %836 = vmatpush3.bf16.msra.mxu0 %v835_v35 }
  0x5f   : > { %837 = vmatprep.subr.bf16.mxu0 %v1052_v0  ;;  %p986_p11 = pnand %p985_p8, %p979_p3 }
  0x61   : > { %818 = vmatpush3.bf16.msra.mxu1 %v817_v17 }
  0x62   : > { %819 = vmatprep.subr.bf16.mxu1 %v1052_v0  ;;  %839 = vmatpush3.bf16.msra.mxu0 %v838_v38 }
  0x63   : > { %840 = vmatprep.subr.bf16.mxu0 %v1052_v0 }
  0x65   : > { %821 = vmatpush3.bf16.msra.mxu1 %v820_v20 }
  0x66   : > { %822 = vmatprep.subr.bf16.mxu1 %v1052_v0  ;;  %842 = vmatpush3.bf16.msra.mxu0 %v841_v41 }
  0x67   : > { %843 = vmatprep.subr.bf16.mxu0 %v1052_v0 }
  0x69   : > { %824 = vmatpush3.bf16.msra.mxu1 %v823_v23 }
  0x6a   : > { %825 = vmatprep.subr.bf16.mxu1 %v1052_v0  ;;  %845 = vmatpush3.bf16.msra.mxu0 %v844_v44 }
  0x6b   : > { %846 = vmatprep.subr.bf16.mxu0 %v1052_v0 }
  0x6d   : > { %827 = vmatpush3.bf16.msra.mxu1 %v826_v26 }
  0x6e   : > { %828 = vmatprep.subr.bf16.mxu1 %v1052_v0  ;;  %848 = vmatpush3.bf16.msra.mxu0 %v847_v47 }
  0x6f   : > { %849 = vmatprep.subr.bf16.mxu0 %v1052_v0 }
  0x71   : > { %830 = vmatpush3.bf16.msra.mxu1 %v829_v29 }
  0x72   : > { %851 = vmatpush3.bf16.msra.mxu0 %v850_v50 }
  0x73   : > { %852 = vmatprep.subr.bf16.mxu0 %v1052_v0  ;;  %v685_v0 = vld [vmem:[%s1309_s6] ss:$0 sm:$0xff] }
  0x76   : > { %854 = vmatpush3.bf16.msra.mxu0 %v853_v58 }
 0x12a   : > { %v384_v52 = vpop.f32.mrb[0].mxu0 }
 0x12b   : > { %v385_v53 = vadd.f32 %v682_v51, %v384_v52  ;;  %v733_v54 = vpop.f32.mrb[1].mxu0 }
 0x12d   : > { %v388_v55 = vmax.f32 %v385_v53, 0.0 }
 0x12f   : > { %767 = vmatmul.mubr.f32.vlgmr.msra.gmra.mrb[0].mxu1 %v388_v55 }
 0x202   : > { %v478_v60 = vpop.f32.mrb[0].mxu1 }
 0x203   : > { %v479_v61 = vadd.f32 %v684_v59, %v478_v60  ;;  %v768_v62 = vpop.f32.mrb[1].mxu1 }
 0x205   : > { %v482_v63 = vmax.f32 %v479_v61, 0.0 }
 0x207   : > { %802 = vmatmul.mubr.f32.vlgmr.msra.gmra.mrb[2].mxu0 %v482_v63 }
 0x2da   : > { %v572_v1 = vpop.f32.mrb[2].mxu0 }
 0x2db   : > { %v573_v2 = vadd.f32 %v685_v0, %v572_v1  ;;  %v803_v3 = vpop.f32.mrb[3].mxu0 }
 0x2dd   : > { %576 = vst [vmem:[%s299_s14] sm:$0xff] %v573_v2 }
 0x2de   : > { %989 = shalt.err (!%p986_p11)
}
 0x2df   : > { %s990_s15 = scalar_lea.hbm %s1261_s22, 128  ;;  %s994_s13 = scalar_lea.hbm %s1310_s7, 512 }
 0x2e0   : > { %p991_p13 = scmp.ne.s32.totalorder %s1261_s22, %s990_s15  ;;  %p995_p6 = scmp.lt.u32.totalorder %s1261_s22, %s1310_s7 }
 0x2e1   : > { %p996_p9 = scmp.lt.u32.totalorder %s994_s13, %s990_s15  ;;  %p998_p12 = scmp.lt.u32.totalorder %s990_s15, %s1261_s22 }
 0x2e2   : > { %p992_p5 = pnand %p991_p13, %p1324_p1 }
 0x2e3   : > { %p997_p10 = por %p996_p9, %p995_p6 }
 0x2e4   : > { %p993_p0 = pneg %p992_p5 }
 0x2e5   : > { %p999_p2 = por %p998_p12, %p997_p10 }
 0x2e7   : > { %p1000_p3 = pnand %p999_p2, %p993_p0 }
 0x2e9   : > { %1003 = shalt.err (!%p1000_p3)
}
 0x2ea   : > { %863 = dma.vmem_to_hbm [thread:$0]  (%p1324_p1), %s1263_s17, 128, %s1261_s22, %s578_s23  }
 0x2eb PF: > { %p880_p4 = scmp.ge.s32.totalorder %s1046_s27, 2  ;;  %s603_s14 = sand.u32 1, %s1034_s24  }
 0x2ec   : > { %p1325_p7 = scmp.ne.s32.totalorder %s1316_s12, 0  ;;  %s604_s20 = scalar_lea.sflag [#allocation4], %s603_s14 }
 0x2ee   : > { %p873_p8 = pnand %p880_p4, %p1325_p7 }
 0x2f0   : > { %1029 = dma.done.wait (!%p873_p8), %s604_s20, 128  }
 0x2f1   : > { %1031 = vsyncadd (!%p873_p8), %s604_s20, 4294967168  ;;  %s1326_s21 = sld [smem:[#allocation11_spill]]  ;;  %p19_p11 = scmp.ge.s32.totalorder %s1121_s30, 6  }
 0x2f2   : > { %s1327_s24 = smov %s1038_s25  ;;  %s1328_s25 = smov %s1042_s26 }
 0x2f3   : > { %s1330_s27 = smov %s1121_s30  ;;  %21 = sbr.rel (!%p19_p11) target bundleno = 5 (0x5), region = 92 }
 0x2f7   : > { %s1329_s26 = smov %s1326_s21 }
 0x2fa   :  { %609 = vsyncpa [#allocation3], 1 }
 0x2fb   :  { %611 = vsyncpa [#allocation3 + $0x1], 1 }
 0x2fc   :  { %612 = vsyncpa [#allocation6], 1 }
 0x2fd   :  { %613 = vsyncpa [#allocation4], 1 }
 0x2fe   :  { %615 = vsyncpa [#allocation4 + $0x1], 1 }

</bundles_post_ra>
